<compile_context>
chip_gen: v5e
topology: v5e:2x2
jax: 0.10.0
libtpu: 0.0.40
codegen_flags: <defaults>
</compile_context>

<pallas_src>
import functools

import numpy as np
import jax
import jax.numpy as jnp
from jax.experimental import pallas as pl
from jax.experimental.pallas import tpu as pltpu


def _gconv_kernel(params_ref, wbd_ref, rho_ref, theta_ref, feat_ref, out_ref,
                  *, n_kernels, n_neigh, in_feat):
    """One grid step = R rows of the flattened (B*K) batch.

    params_ref : SMEM (4*n_kernels,) f32  -> [mean_rho | mean_theta | scale_rho | scale_theta]
                 with scale = -0.5 / (1e-14 + precision**2)  (hoisted in the wrapper)
    wbd_ref    : VMEM (n_kernels*in_feat, out_feat)  block-diagonal projection weight (resident)
    rho_ref    : VMEM (R, N)
    theta_ref  : VMEM (R, N)
    feat_ref   : VMEM (R, N*in_feat)   lane-dense feature slab
    out_ref    : VMEM (R, out_feat)
    """
    two_pi = jnp.float32(2.0 * np.pi)

    rho = rho_ref[...]        # (R, N)
    theta = theta_ref[...]    # (R, N)
    feat = feat_ref[...]      # (R, N*Fin)

    # --- Gaussian mixture weights, unrolled over the (small, static) kernel axis ---
    wks = []
    for k in range(n_kernels):
        mean_rho = params_ref[k]
        mean_theta = params_ref[n_kernels + k]
        scale_rho = params_ref[2 * n_kernels + k]
        scale_theta = params_ref[3 * n_kernels + k]

        d_rho = rho - mean_rho
        first_angle = jnp.abs(theta - mean_theta)
        second_angle = jnp.abs(two_pi - first_angle)
        ang = jnp.minimum(first_angle, second_angle)
        # exp(a) * exp(b) == exp(a + b): one EUP exp per kernel instead of two.
        wk = jnp.exp(scale_rho * d_rho * d_rho + scale_theta * ang * ang)   # (R, N)
        # torch: weights[weights != weights] = 0  (NaN -> 0), applied before normalisation.
        wk = jnp.where(wk != wk, jnp.zeros_like(wk), wk)
        wks.append(wk)

    # Normalise over the kernel axis (torch's dim=1 on the flattened (B*K*N, nk) view).
    total = wks[0]
    for k in range(1, n_kernels):
        total = total + wks[k]
    inv = 1.0 / total                                                        # (R, N)

    # --- weights^T @ features: VPU multiply-accumulate over the N neighbours ---
    chunks = []
    for k in range(n_kernels):
        wn = wks[k] * inv                                                    # (R, N)
        acc = wn[:, 0:1] * feat[:, 0:in_feat]                                # (R, Fin)
        for n in range(1, n_neigh):
            acc = acc + wn[:, n:n + 1] * feat[:, n * in_feat:(n + 1) * in_feat]
        chunks.append(acc)
    weighted = jnp.concatenate(chunks, axis=1)                               # (R, nk*Fin)

    # --- all per-kernel Linear projections as one MXU matmul (block-diagonal weight) ---
    out_ref[...] = jnp.dot(weighted, wbd_ref[...],
                           preferred_element_type=jnp.float32).astype(out_ref.dtype)


def image_query_graph_conv(features, coords, gauss_params, w_stacked, *, row_tile=None):
    """features: (B, K, N, Fin); coords: (B, K, N, 2);
    gauss_params: (4, n_kernels) rows = [mean_rho, mean_theta, prec_rho, prec_theta];
    w_stacked: (n_kernels, Fin, Fout // n_kernels) (pre-transposed Linear weights).
    Returns (B, K, Fout)."""
    B, K, N, Fin = features.shape
    nk, _, out_per_k = w_stacked.shape
    Fout = nk * out_per_k
    BK = B * K

    # Lane-dense slabs for the DMA stream.
    feat = features.reshape(BK, N * Fin)
    rho = coords[..., 0].reshape(BK, N)
    theta = coords[..., 1].reshape(BK, N)

    # Hoist the per-kernel constants: scale = -0.5 / (1e-14 + precision**2).
    mean_rho, mean_theta, prec_rho, prec_theta = (gauss_params[i] for i in range(4))
    scale_rho = -0.5 / (1e-14 + prec_rho ** 2)
    scale_theta = -0.5 / (1e-14 + prec_theta ** 2)
    params = jnp.concatenate(
        [mean_rho, mean_theta, scale_rho, scale_theta]).astype(jnp.float32)   # (4*nk,)

    # Block-diagonal projection weight: (nk*Fin, Fout).
    w_bd = jnp.zeros((nk * Fin, Fout), dtype=w_stacked.dtype)
    for k in range(nk):
        w_bd = w_bd.at[k * Fin:(k + 1) * Fin, k * out_per_k:(k + 1) * out_per_k].set(w_stacked[k])

    # Row tile: as large as possible (target 256 rows) while dividing BK and keeping the
    # second-to-last block dim a multiple of 8 (or the full dim).
    if row_tile is None:
        row_tile = min(256, BK)
    R = row_tile
    while R > 1 and (BK % R != 0 or (R % 8 != 0 and R != BK)):
        R -= 1
    assert BK % R == 0 and (R % 8 == 0 or R == BK), (BK, R)

    out = pl.pallas_call(
        functools.partial(_gconv_kernel, n_kernels=nk, n_neigh=N, in_feat=Fin),
        out_shape=jax.ShapeDtypeStruct((BK, Fout), features.dtype),
        grid_spec=pltpu.PrefetchScalarGridSpec(
            num_scalar_prefetch=0,
            grid=(BK // R,),
            in_specs=[
                pl.BlockSpec(memory_space=pltpu.MemorySpace.SMEM),          # gaussian params
                pl.BlockSpec((nk * Fin, Fout), lambda i: (0, 0)),           # block-diag proj weight
                pl.BlockSpec((R, N), lambda i: (i, 0)),                     # rho rows
                pl.BlockSpec((R, N), lambda i: (i, 0)),                     # theta rows
                pl.BlockSpec((R, N * Fin), lambda i: (i, 0)),               # feature rows (lane-dense)
            ],
            out_specs=pl.BlockSpec((R, Fout), lambda i: (i, 0)),
        ),
        compiler_params=pltpu.CompilerParams(dimension_semantics=("parallel",)),
    )(params, w_bd, rho, theta, feat)

    return out.reshape(B, K, Fout)


def reference(features, coords, gauss_params, w_stacked):
    """Pure-JAX reference mirroring the PyTorch forward."""
    B, K, N, Fin = features.shape
    nk = gauss_params.shape[1]
    mean_rho, mean_theta, prec_rho, prec_theta = (gauss_params[i] for i in range(4))
    rho = coords[..., 0].reshape(-1, 1)
    theta = coords[..., 1].reshape(-1, 1)
    diff = (rho - mean_rho[None, :]) ** 2
    w_rho = jnp.exp(-0.5 * diff / (1e-14 + prec_rho[None, :] ** 2))
    fa = jnp.abs(theta - mean_theta[None, :])
    sa = jnp.abs(2.0 * np.pi - fa)
    w_theta = jnp.exp(-0.5 * jnp.minimum(fa, sa) ** 2 / (1e-14 + prec_theta[None, :] ** 2))
    w = w_rho * w_theta
    w = jnp.where(jnp.isnan(w), 0.0, w)
    w = w / jnp.sum(w, axis=1, keepdims=True)
    w = w.reshape(B * K, N, nk)
    feat = features.reshape(B * K, N, Fin)
    weighted = jnp.einsum("bnk,bnf->bkf", w, feat)
    proj = jnp.einsum("bkf,kfo->bko", weighted, w_stacked)
    return proj.reshape(B, K, -1)


if __name__ == "__main__":
    # Module hyper-parameters (bias=False, the module default).
    B, K, N = 2, 8, 8
    in_feat, out_feat, n_kernels, coord_dim = 32, 32, 4, 2
    out_per_k = out_feat // n_kernels

    key = jax.random.PRNGKey(0)
    ks = jax.random.split(key, 8)

    # Inputs.
    features = jax.random.normal(ks[0], (B, K, N, in_feat), jnp.float32)
    rho = jax.random.uniform(ks[1], (B, K, N, 1), jnp.float32, 0.0, 1.0)
    theta = jax.random.uniform(ks[2], (B, K, N, 1), jnp.float32, -np.pi, np.pi)
    coords = jnp.concatenate([rho, theta], axis=-1)

    # Deterministic parameter init mirroring init_parameters() ranges.
    mean_rho = jax.random.uniform(ks[3], (n_kernels,), jnp.float32, 0.0, 1.0)
    mean_theta = jax.random.uniform(ks[4], (n_kernels,), jnp.float32, -np.pi, np.pi)
    prec_rho = jax.random.uniform(ks[5], (n_kernels,), jnp.float32, 0.0, 1.0)
    prec_theta = jax.random.uniform(ks[6], (n_kernels,), jnp.float32, 0.0, 1.0)
    gauss_params = jnp.stack([mean_rho, mean_theta, prec_rho, prec_theta], axis=0)  # (4, nk)

    # nn.Linear weights: stored here pre-transposed as (nk, in_feat, out_per_k),
    # scaled like the default PyTorch Linear init.
    bound = 1.0 / np.sqrt(in_feat)
    w_stacked = jax.random.uniform(
        ks[7], (n_kernels, in_feat, out_per_k), jnp.float32, -bound, bound)

    # row_tile=8 -> grid of 2 steps for this toy size (exercises the pipelined multi-step
    # path); production sizes default to 256-row tiles.
    out = jax.block_until_ready(
        image_query_graph_conv(features, coords, gauss_params, w_stacked, row_tile=8))
    ref = reference(features, coords, gauss_params, w_stacked)

    assert out.shape == (B, K, out_feat), out.shape
    assert jnp.allclose(out, ref, atol=1e-4, rtol=1e-4), float(jnp.max(jnp.abs(out - ref)))
    print("KERNEL_OK")
</pallas_src>

<mosaic_0001>
module attributes {stable_mosaic.version = 11 : i64} {
  func.func @_gconv_kernel(%arg0: i32, %arg1: memref<16xf32, #tpu.memory_space<smem>>, %arg2: memref<128x32xf32, #tpu.memory_space<vmem>>, %arg3: memref<8x8xf32, #tpu.memory_space<vmem>>, %arg4: memref<8x8xf32, #tpu.memory_space<vmem>>, %arg5: memref<8x256xf32, #tpu.memory_space<vmem>>, %arg6: memref<8x32xf32, #tpu.memory_space<vmem>>) attributes {dimension_semantics = [#tpu.dimension_semantics<parallel>], iteration_bounds = array<i64: 2>, scalar_prefetch = 0 : i64, scratch_operands = 0 : i64, tpu.core_type = #tpu.core_type<tc>, window_params = [{transform_indices = @transform_0, window_bounds = array<i64: 16>}, {pipeline_mode = #tpu.pipeline_mode<synchronous>, transform_indices = @transform_1, window_bounds = array<i64: 128, 32>}, {transform_indices = @transform_2, window_bounds = array<i64: 8, 8>}, {transform_indices = @transform_3, window_bounds = array<i64: 8, 8>}, {transform_indices = @transform_4, window_bounds = array<i64: 8, 256>}, {transform_indices = @transform_5, window_bounds = array<i64: 8, 32>}]} {
    %c0 = arith.constant 0 : index
    %c0_0 = arith.constant 0 : index
    %0 = vector.load %arg3[%c0, %c0_0] : memref<8x8xf32, #tpu.memory_space<vmem>>, vector<8x8xf32>
    %c0_1 = arith.constant 0 : index
    %c0_2 = arith.constant 0 : index
    %1 = vector.load %arg4[%c0_1, %c0_2] : memref<8x8xf32, #tpu.memory_space<vmem>>, vector<8x8xf32>
    %c0_3 = arith.constant 0 : index
    %c0_4 = arith.constant 0 : index
    %2 = vector.load %arg5[%c0_3, %c0_4] : memref<8x256xf32, #tpu.memory_space<vmem>>, vector<8x256xf32>
    %c0_5 = arith.constant 0 : index
    %3 = memref.load %arg1[%c0_5] : memref<16xf32, #tpu.memory_space<smem>>
    %c4 = arith.constant 4 : index
    %4 = memref.load %arg1[%c4] : memref<16xf32, #tpu.memory_space<smem>>
    %c8 = arith.constant 8 : index
    %5 = memref.load %arg1[%c8] : memref<16xf32, #tpu.memory_space<smem>>
    %c12 = arith.constant 12 : index
    %6 = memref.load %arg1[%c12] : memref<16xf32, #tpu.memory_space<smem>>
    %7 = vector.broadcast %3 : f32 to vector<8x8xf32>
    %8 = arith.subf %0, %7 : vector<8x8xf32>
    %9 = vector.broadcast %4 : f32 to vector<8x8xf32>
    %10 = arith.subf %1, %9 : vector<8x8xf32>
    %11 = math.absf %10 : vector<8x8xf32>
    %cst = arith.constant 6.28318548 : f32
    %12 = vector.broadcast %cst : f32 to vector<8x8xf32>
    %13 = arith.subf %12, %11 : vector<8x8xf32>
    %14 = math.absf %13 : vector<8x8xf32>
    %15 = arith.minimumf %11, %14 : vector<8x8xf32>
    %16 = vector.broadcast %5 : f32 to vector<8x8xf32>
    %17 = arith.mulf %16, %8 : vector<8x8xf32>
    %18 = arith.mulf %17, %8 : vector<8x8xf32>
    %19 = vector.broadcast %6 : f32 to vector<8x8xf32>
    %20 = arith.mulf %19, %15 : vector<8x8xf32>
    %21 = arith.mulf %20, %15 : vector<8x8xf32>
    %22 = arith.addf %18, %21 : vector<8x8xf32>
    %23 = math.exp %22 : vector<8x8xf32>
    %24 = arith.cmpf one, %23, %23 : vector<8x8xf32>
    %cst_6 = arith.constant 0.000000e+00 : f32
    %25 = vector.broadcast %cst_6 : f32 to vector<8x8xf32>
    %26 = arith.select %24, %25, %23 : vector<8x8xi1>, vector<8x8xf32>
    %c1 = arith.constant 1 : index
    %27 = memref.load %arg1[%c1] : memref<16xf32, #tpu.memory_space<smem>>
    %c5 = arith.constant 5 : index
    %28 = memref.load %arg1[%c5] : memref<16xf32, #tpu.memory_space<smem>>
    %c9 = arith.constant 9 : index
    %29 = memref.load %arg1[%c9] : memref<16xf32, #tpu.memory_space<smem>>
    %c13 = arith.constant 13 : index
    %30 = memref.load %arg1[%c13] : memref<16xf32, #tpu.memory_space<smem>>
    %31 = vector.broadcast %27 : f32 to vector<8x8xf32>
    %32 = arith.subf %0, %31 : vector<8x8xf32>
    %33 = vector.broadcast %28 : f32 to vector<8x8xf32>
    %34 = arith.subf %1, %33 : vector<8x8xf32>
    %35 = math.absf %34 : vector<8x8xf32>
    %cst_7 = arith.constant 6.28318548 : f32
    %36 = vector.broadcast %cst_7 : f32 to vector<8x8xf32>
    %37 = arith.subf %36, %35 : vector<8x8xf32>
    %38 = math.absf %37 : vector<8x8xf32>
    %39 = arith.minimumf %35, %38 : vector<8x8xf32>
    %40 = vector.broadcast %29 : f32 to vector<8x8xf32>
    %41 = arith.mulf %40, %32 : vector<8x8xf32>
    %42 = arith.mulf %41, %32 : vector<8x8xf32>
    %43 = vector.broadcast %30 : f32 to vector<8x8xf32>
    %44 = arith.mulf %43, %39 : vector<8x8xf32>
    %45 = arith.mulf %44, %39 : vector<8x8xf32>
    %46 = arith.addf %42, %45 : vector<8x8xf32>
    %47 = math.exp %46 : vector<8x8xf32>
    %48 = arith.cmpf one, %47, %47 : vector<8x8xf32>
    %cst_8 = arith.constant 0.000000e+00 : f32
    %49 = vector.broadcast %cst_8 : f32 to vector<8x8xf32>
    %50 = arith.select %48, %49, %47 : vector<8x8xi1>, vector<8x8xf32>
    %c2 = arith.constant 2 : index
    %51 = memref.load %arg1[%c2] : memref<16xf32, #tpu.memory_space<smem>>
    %c6 = arith.constant 6 : index
    %52 = memref.load %arg1[%c6] : memref<16xf32, #tpu.memory_space<smem>>
    %c10 = arith.constant 10 : index
    %53 = memref.load %arg1[%c10] : memref<16xf32, #tpu.memory_space<smem>>
    %c14 = arith.constant 14 : index
    %54 = memref.load %arg1[%c14] : memref<16xf32, #tpu.memory_space<smem>>
    %55 = vector.broadcast %51 : f32 to vector<8x8xf32>
    %56 = arith.subf %0, %55 : vector<8x8xf32>
    %57 = vector.broadcast %52 : f32 to vector<8x8xf32>
    %58 = arith.subf %1, %57 : vector<8x8xf32>
    %59 = math.absf %58 : vector<8x8xf32>
    %cst_9 = arith.constant 6.28318548 : f32
    %60 = vector.broadcast %cst_9 : f32 to vector<8x8xf32>
    %61 = arith.subf %60, %59 : vector<8x8xf32>
    %62 = math.absf %61 : vector<8x8xf32>
    %63 = arith.minimumf %59, %62 : vector<8x8xf32>
    %64 = vector.broadcast %53 : f32 to vector<8x8xf32>
    %65 = arith.mulf %64, %56 : vector<8x8xf32>
    %66 = arith.mulf %65, %56 : vector<8x8xf32>
    %67 = vector.broadcast %54 : f32 to vector<8x8xf32>
    %68 = arith.mulf %67, %63 : vector<8x8xf32>
    %69 = arith.mulf %68, %63 : vector<8x8xf32>
    %70 = arith.addf %66, %69 : vector<8x8xf32>
    %71 = math.exp %70 : vector<8x8xf32>
    %72 = arith.cmpf one, %71, %71 : vector<8x8xf32>
    %cst_10 = arith.constant 0.000000e+00 : f32
    %73 = vector.broadcast %cst_10 : f32 to vector<8x8xf32>
    %74 = arith.select %72, %73, %71 : vector<8x8xi1>, vector<8x8xf32>
    %c3 = arith.constant 3 : index
    %75 = memref.load %arg1[%c3] : memref<16xf32, #tpu.memory_space<smem>>
    %c7 = arith.constant 7 : index
    %76 = memref.load %arg1[%c7] : memref<16xf32, #tpu.memory_space<smem>>
    %c11 = arith.constant 11 : index
    %77 = memref.load %arg1[%c11] : memref<16xf32, #tpu.memory_space<smem>>
    %c15 = arith.constant 15 : index
    %78 = memref.load %arg1[%c15] : memref<16xf32, #tpu.memory_space<smem>>
    %79 = vector.broadcast %75 : f32 to vector<8x8xf32>
    %80 = arith.subf %0, %79 : vector<8x8xf32>
    %81 = vector.broadcast %76 : f32 to vector<8x8xf32>
    %82 = arith.subf %1, %81 : vector<8x8xf32>
    %83 = math.absf %82 : vector<8x8xf32>
    %cst_11 = arith.constant 6.28318548 : f32
    %84 = vector.broadcast %cst_11 : f32 to vector<8x8xf32>
    %85 = arith.subf %84, %83 : vector<8x8xf32>
    %86 = math.absf %85 : vector<8x8xf32>
    %87 = arith.minimumf %83, %86 : vector<8x8xf32>
    %88 = vector.broadcast %77 : f32 to vector<8x8xf32>
    %89 = arith.mulf %88, %80 : vector<8x8xf32>
    %90 = arith.mulf %89, %80 : vector<8x8xf32>
    %91 = vector.broadcast %78 : f32 to vector<8x8xf32>
    %92 = arith.mulf %91, %87 : vector<8x8xf32>
    %93 = arith.mulf %92, %87 : vector<8x8xf32>
    %94 = arith.addf %90, %93 : vector<8x8xf32>
    %95 = math.exp %94 : vector<8x8xf32>
    %96 = arith.cmpf one, %95, %95 : vector<8x8xf32>
    %cst_12 = arith.constant 0.000000e+00 : f32
    %97 = vector.broadcast %cst_12 : f32 to vector<8x8xf32>
    %98 = arith.select %96, %97, %95 : vector<8x8xi1>, vector<8x8xf32>
    %99 = arith.addf %26, %50 : vector<8x8xf32>
    %100 = arith.addf %99, %74 : vector<8x8xf32>
    %101 = arith.addf %100, %98 : vector<8x8xf32>
    %cst_13 = arith.constant 1.000000e+00 : f32
    %102 = vector.broadcast %cst_13 : f32 to vector<8x8xf32>
    %103 = arith.divf %102, %101 : vector<8x8xf32>
    %104 = arith.mulf %26, %103 : vector<8x8xf32>
    %105 = vector.extract_strided_slice %104 {offsets = [0, 0], sizes = [8, 1], strides = [1, 1]} : vector<8x8xf32> to vector<8x1xf32>
    %106 = vector.extract_strided_slice %2 {offsets = [0, 0], sizes = [8, 32], strides = [1, 1]} : vector<8x256xf32> to vector<8x32xf32>
    %107 = vector.broadcast %105 : vector<8x1xf32> to vector<8x32xf32>
    %108 = arith.mulf %107, %106 : vector<8x32xf32>
    %109 = vector.extract_strided_slice %104 {offsets = [0, 1], sizes = [8, 1], strides = [1, 1]} : vector<8x8xf32> to vector<8x1xf32>
    %110 = vector.extract_strided_slice %2 {offsets = [0, 32], sizes = [8, 32], strides = [1, 1]} : vector<8x256xf32> to vector<8x32xf32>
    %111 = vector.broadcast %109 : vector<8x1xf32> to vector<8x32xf32>
    %112 = arith.mulf %111, %110 : vector<8x32xf32>
    %113 = arith.addf %108, %112 : vector<8x32xf32>
    %114 = vector.extract_strided_slice %104 {offsets = [0, 2], sizes = [8, 1], strides = [1, 1]} : vector<8x8xf32> to vector<8x1xf32>
    %115 = vector.extract_strided_slice %2 {offsets = [0, 64], sizes = [8, 32], strides = [1, 1]} : vector<8x256xf32> to vector<8x32xf32>
    %116 = vector.broadcast %114 : vector<8x1xf32> to vector<8x32xf32>
    %117 = arith.mulf %116, %115 : vector<8x32xf32>
    %118 = arith.addf %113, %117 : vector<8x32xf32>
    %119 = vector.extract_strided_slice %104 {offsets = [0, 3], sizes = [8, 1], strides = [1, 1]} : vector<8x8xf32> to vector<8x1xf32>
    %120 = vector.extract_strided_slice %2 {offsets = [0, 96], sizes = [8, 32], strides = [1, 1]} : vector<8x256xf32> to vector<8x32xf32>
    %121 = vector.broadcast %119 : vector<8x1xf32> to vector<8x32xf32>
    %122 = arith.mulf %121, %120 : vector<8x32xf32>
    %123 = arith.addf %118, %122 : vector<8x32xf32>
    %124 = vector.extract_strided_slice %104 {offsets = [0, 4], sizes = [8, 1], strides = [1, 1]} : vector<8x8xf32> to vector<8x1xf32>
    %125 = vector.extract_strided_slice %2 {offsets = [0, 128], sizes = [8, 32], strides = [1, 1]} : vector<8x256xf32> to vector<8x32xf32>
    %126 = vector.broadcast %124 : vector<8x1xf32> to vector<8x32xf32>
    %127 = arith.mulf %126, %125 : vector<8x32xf32>
    %128 = arith.addf %123, %127 : vector<8x32xf32>
    %129 = vector.extract_strided_slice %104 {offsets = [0, 5], sizes = [8, 1], strides = [1, 1]} : vector<8x8xf32> to vector<8x1xf32>
    %130 = vector.extract_strided_slice %2 {offsets = [0, 160], sizes = [8, 32], strides = [1, 1]} : vector<8x256xf32> to vector<8x32xf32>
    %131 = vector.broadcast %129 : vector<8x1xf32> to vector<8x32xf32>
    %132 = arith.mulf %131, %130 : vector<8x32xf32>
    %133 = arith.addf %128, %132 : vector<8x32xf32>
    %134 = vector.extract_strided_slice %104 {offsets = [0, 6], sizes = [8, 1], strides = [1, 1]} : vector<8x8xf32> to vector<8x1xf32>
    %135 = vector.extract_strided_slice %2 {offsets = [0, 192], sizes = [8, 32], strides = [1, 1]} : vector<8x256xf32> to vector<8x32xf32>
    %136 = vector.broadcast %134 : vector<8x1xf32> to vector<8x32xf32>
    %137 = arith.mulf %136, %135 : vector<8x32xf32>
    %138 = arith.addf %133, %137 : vector<8x32xf32>
    %139 = vector.extract_strided_slice %104 {offsets = [0, 7], sizes = [8, 1], strides = [1, 1]} : vector<8x8xf32> to vector<8x1xf32>
    %140 = vector.extract_strided_slice %2 {offsets = [0, 224], sizes = [8, 32], strides = [1, 1]} : vector<8x256xf32> to vector<8x32xf32>
    %141 = vector.broadcast %139 : vector<8x1xf32> to vector<8x32xf32>
    %142 = arith.mulf %141, %140 : vector<8x32xf32>
    %143 = arith.addf %138, %142 : vector<8x32xf32>
    %144 = arith.mulf %50, %103 : vector<8x8xf32>
    %145 = vector.extract_strided_slice %144 {offsets = [0, 0], sizes = [8, 1], strides = [1, 1]} : vector<8x8xf32> to vector<8x1xf32>
    %146 = vector.extract_strided_slice %2 {offsets = [0, 0], sizes = [8, 32], strides = [1, 1]} : vector<8x256xf32> to vector<8x32xf32>
    %147 = vector.broadcast %145 : vector<8x1xf32> to vector<8x32xf32>
    %148 = arith.mulf %147, %146 : vector<8x32xf32>
    %149 = vector.extract_strided_slice %144 {offsets = [0, 1], sizes = [8, 1], strides = [1, 1]} : vector<8x8xf32> to vector<8x1xf32>
    %150 = vector.extract_strided_slice %2 {offsets = [0, 32], sizes = [8, 32], strides = [1, 1]} : vector<8x256xf32> to vector<8x32xf32>
    %151 = vector.broadcast %149 : vector<8x1xf32> to vector<8x32xf32>
    %152 = arith.mulf %151, %150 : vector<8x32xf32>
    %153 = arith.addf %148, %152 : vector<8x32xf32>
    %154 = vector.extract_strided_slice %144 {offsets = [0, 2], sizes = [8, 1], strides = [1, 1]} : vector<8x8xf32> to vector<8x1xf32>
    %155 = vector.extract_strided_slice %2 {offsets = [0, 64], sizes = [8, 32], strides = [1, 1]} : vector<8x256xf32> to vector<8x32xf32>
    %156 = vector.broadcast %154 : vector<8x1xf32> to vector<8x32xf32>
    %157 = arith.mulf %156, %155 : vector<8x32xf32>
    %158 = arith.addf %153, %157 : vector<8x32xf32>
    %159 = vector.extract_strided_slice %144 {offsets = [0, 3], sizes = [8, 1], strides = [1, 1]} : vector<8x8xf32> to vector<8x1xf32>
    %160 = vector.extract_strided_slice %2 {offsets = [0, 96], sizes = [8, 32], strides = [1, 1]} : vector<8x256xf32> to vector<8x32xf32>
    %161 = vector.broadcast %159 : vector<8x1xf32> to vector<8x32xf32>
    %162 = arith.mulf %161, %160 : vector<8x32xf32>
    %163 = arith.addf %158, %162 : vector<8x32xf32>
    %164 = vector.extract_strided_slice %144 {offsets = [0, 4], sizes = [8, 1], strides = [1, 1]} : vector<8x8xf32> to vector<8x1xf32>
    %165 = vector.extract_strided_slice %2 {offsets = [0, 128], sizes = [8, 32], strides = [1, 1]} : vector<8x256xf32> to vector<8x32xf32>
    %166 = vector.broadcast %164 : vector<8x1xf32> to vector<8x32xf32>
    %167 = arith.mulf %166, %165 : vector<8x32xf32>
    %168 = arith.addf %163, %167 : vector<8x32xf32>
    %169 = vector.extract_strided_slice %144 {offsets = [0, 5], sizes = [8, 1], strides = [1, 1]} : vector<8x8xf32> to vector<8x1xf32>
    %170 = vector.extract_strided_slice %2 {offsets = [0, 160], sizes = [8, 32], strides = [1, 1]} : vector<8x256xf32> to vector<8x32xf32>
    %171 = vector.broadcast %169 : vector<8x1xf32> to vector<8x32xf32>
    %172 = arith.mulf %171, %170 : vector<8x32xf32>
    %173 = arith.addf %168, %172 : vector<8x32xf32>
    %174 = vector.extract_strided_slice %144 {offsets = [0, 6], sizes = [8, 1], strides = [1, 1]} : vector<8x8xf32> to vector<8x1xf32>
    %175 = vector.extract_strided_slice %2 {offsets = [0, 192], sizes = [8, 32], strides = [1, 1]} : vector<8x256xf32> to vector<8x32xf32>
    %176 = vector.broadcast %174 : vector<8x1xf32> to vector<8x32xf32>
    %177 = arith.mulf %176, %175 : vector<8x32xf32>
    %178 = arith.addf %173, %177 : vector<8x32xf32>
    %179 = vector.extract_strided_slice %144 {offsets = [0, 7], sizes = [8, 1], strides = [1, 1]} : vector<8x8xf32> to vector<8x1xf32>
    %180 = vector.extract_strided_slice %2 {offsets = [0, 224], sizes = [8, 32], strides = [1, 1]} : vector<8x256xf32> to vector<8x32xf32>
    %181 = vector.broadcast %179 : vector<8x1xf32> to vector<8x32xf32>
    %182 = arith.mulf %181, %180 : vector<8x32xf32>
    %183 = arith.addf %178, %182 : vector<8x32xf32>
    %184 = arith.mulf %74, %103 : vector<8x8xf32>
    %185 = vector.extract_strided_slice %184 {offsets = [0, 0], sizes = [8, 1], strides = [1, 1]} : vector<8x8xf32> to vector<8x1xf32>
    %186 = vector.extract_strided_slice %2 {offsets = [0, 0], sizes = [8, 32], strides = [1, 1]} : vector<8x256xf32> to vector<8x32xf32>
    %187 = vector.broadcast %185 : vector<8x1xf32> to vector<8x32xf32>
    %188 = arith.mulf %187, %186 : vector<8x32xf32>
    %189 = vector.extract_strided_slice %184 {offsets = [0, 1], sizes = [8, 1], strides = [1, 1]} : vector<8x8xf32> to vector<8x1xf32>
    %190 = vector.extract_strided_slice %2 {offsets = [0, 32], sizes = [8, 32], strides = [1, 1]} : vector<8x256xf32> to vector<8x32xf32>
    %191 = vector.broadcast %189 : vector<8x1xf32> to vector<8x32xf32>
    %192 = arith.mulf %191, %190 : vector<8x32xf32>
    %193 = arith.addf %188, %192 : vector<8x32xf32>
    %194 = vector.extract_strided_slice %184 {offsets = [0, 2], sizes = [8, 1], strides = [1, 1]} : vector<8x8xf32> to vector<8x1xf32>
    %195 = vector.extract_strided_slice %2 {offsets = [0, 64], sizes = [8, 32], strides = [1, 1]} : vector<8x256xf32> to vector<8x32xf32>
    %196 = vector.broadcast %194 : vector<8x1xf32> to vector<8x32xf32>
    %197 = arith.mulf %196, %195 : vector<8x32xf32>
    %198 = arith.addf %193, %197 : vector<8x32xf32>
    %199 = vector.extract_strided_slice %184 {offsets = [0, 3], sizes = [8, 1], strides = [1, 1]} : vector<8x8xf32> to vector<8x1xf32>
    %200 = vector.extract_strided_slice %2 {offsets = [0, 96], sizes = [8, 32], strides = [1, 1]} : vector<8x256xf32> to vector<8x32xf32>
    %201 = vector.broadcast %199 : vector<8x1xf32> to vector<8x32xf32>
    %202 = arith.mulf %201, %200 : vector<8x32xf32>
    %203 = arith.addf %198, %202 : vector<8x32xf32>
    %204 = vector.extract_strided_slice %184 {offsets = [0, 4], sizes = [8, 1], strides = [1, 1]} : vector<8x8xf32> to vector<8x1xf32>
    %205 = vector.extract_strided_slice %2 {offsets = [0, 128], sizes = [8, 32], strides = [1, 1]} : vector<8x256xf32> to vector<8x32xf32>
    %206 = vector.broadcast %204 : vector<8x1xf32> to vector<8x32xf32>
    %207 = arith.mulf %206, %205 : vector<8x32xf32>
    %208 = arith.addf %203, %207 : vector<8x32xf32>
    %209 = vector.extract_strided_slice %184 {offsets = [0, 5], sizes = [8, 1], strides = [1, 1]} : vector<8x8xf32> to vector<8x1xf32>
    %210 = vector.extract_strided_slice %2 {offsets = [0, 160], sizes = [8, 32], strides = [1, 1]} : vector<8x256xf32> to vector<8x32xf32>
    %211 = vector.broadcast %209 : vector<8x1xf32> to vector<8x32xf32>
    %212 = arith.mulf %211, %210 : vector<8x32xf32>
    %213 = arith.addf %208, %212 : vector<8x32xf32>
    %214 = vector.extract_strided_slice %184 {offsets = [0, 6], sizes = [8, 1], strides = [1, 1]} : vector<8x8xf32> to vector<8x1xf32>
    %215 = vector.extract_strided_slice %2 {offsets = [0, 192], sizes = [8, 32], strides = [1, 1]} : vector<8x256xf32> to vector<8x32xf32>
    %216 = vector.broadcast %214 : vector<8x1xf32> to vector<8x32xf32>
    %217 = arith.mulf %216, %215 : vector<8x32xf32>
    %218 = arith.addf %213, %217 : vector<8x32xf32>
    %219 = vector.extract_strided_slice %184 {offsets = [0, 7], sizes = [8, 1], strides = [1, 1]} : vector<8x8xf32> to vector<8x1xf32>
    %220 = vector.extract_strided_slice %2 {offsets = [0, 224], sizes = [8, 32], strides = [1, 1]} : vector<8x256xf32> to vector<8x32xf32>
    %221 = vector.broadcast %219 : vector<8x1xf32> to vector<8x32xf32>
    %222 = arith.mulf %221, %220 : vector<8x32xf32>
    %223 = arith.addf %218, %222 : vector<8x32xf32>
    %224 = arith.mulf %98, %103 : vector<8x8xf32>
    %225 = vector.extract_strided_slice %224 {offsets = [0, 0], sizes = [8, 1], strides = [1, 1]} : vector<8x8xf32> to vector<8x1xf32>
    %226 = vector.extract_strided_slice %2 {offsets = [0, 0], sizes = [8, 32], strides = [1, 1]} : vector<8x256xf32> to vector<8x32xf32>
    %227 = vector.broadcast %225 : vector<8x1xf32> to vector<8x32xf32>
    %228 = arith.mulf %227, %226 : vector<8x32xf32>
    %229 = vector.extract_strided_slice %224 {offsets = [0, 1], sizes = [8, 1], strides = [1, 1]} : vector<8x8xf32> to vector<8x1xf32>
    %230 = vector.extract_strided_slice %2 {offsets = [0, 32], sizes = [8, 32], strides = [1, 1]} : vector<8x256xf32> to vector<8x32xf32>
    %231 = vector.broadcast %229 : vector<8x1xf32> to vector<8x32xf32>
    %232 = arith.mulf %231, %230 : vector<8x32xf32>
    %233 = arith.addf %228, %232 : vector<8x32xf32>
    %234 = vector.extract_strided_slice %224 {offsets = [0, 2], sizes = [8, 1], strides = [1, 1]} : vector<8x8xf32> to vector<8x1xf32>
    %235 = vector.extract_strided_slice %2 {offsets = [0, 64], sizes = [8, 32], strides = [1, 1]} : vector<8x256xf32> to vector<8x32xf32>
    %236 = vector.broadcast %234 : vector<8x1xf32> to vector<8x32xf32>
    %237 = arith.mulf %236, %235 : vector<8x32xf32>
    %238 = arith.addf %233, %237 : vector<8x32xf32>
    %239 = vector.extract_strided_slice %224 {offsets = [0, 3], sizes = [8, 1], strides = [1, 1]} : vector<8x8xf32> to vector<8x1xf32>
    %240 = vector.extract_strided_slice %2 {offsets = [0, 96], sizes = [8, 32], strides = [1, 1]} : vector<8x256xf32> to vector<8x32xf32>
    %241 = vector.broadcast %239 : vector<8x1xf32> to vector<8x32xf32>
    %242 = arith.mulf %241, %240 : vector<8x32xf32>
    %243 = arith.addf %238, %242 : vector<8x32xf32>
    %244 = vector.extract_strided_slice %224 {offsets = [0, 4], sizes = [8, 1], strides = [1, 1]} : vector<8x8xf32> to vector<8x1xf32>
    %245 = vector.extract_strided_slice %2 {offsets = [0, 128], sizes = [8, 32], strides = [1, 1]} : vector<8x256xf32> to vector<8x32xf32>
    %246 = vector.broadcast %244 : vector<8x1xf32> to vector<8x32xf32>
    %247 = arith.mulf %246, %245 : vector<8x32xf32>
    %248 = arith.addf %243, %247 : vector<8x32xf32>
    %249 = vector.extract_strided_slice %224 {offsets = [0, 5], sizes = [8, 1], strides = [1, 1]} : vector<8x8xf32> to vector<8x1xf32>
    %250 = vector.extract_strided_slice %2 {offsets = [0, 160], sizes = [8, 32], strides = [1, 1]} : vector<8x256xf32> to vector<8x32xf32>
    %251 = vector.broadcast %249 : vector<8x1xf32> to vector<8x32xf32>
    %252 = arith.mulf %251, %250 : vector<8x32xf32>
    %253 = arith.addf %248, %252 : vector<8x32xf32>
    %254 = vector.extract_strided_slice %224 {offsets = [0, 6], sizes = [8, 1], strides = [1, 1]} : vector<8x8xf32> to vector<8x1xf32>
    %255 = vector.extract_strided_slice %2 {offsets = [0, 192], sizes = [8, 32], strides = [1, 1]} : vector<8x256xf32> to vector<8x32xf32>
    %256 = vector.broadcast %254 : vector<8x1xf32> to vector<8x32xf32>
    %257 = arith.mulf %256, %255 : vector<8x32xf32>
    %258 = arith.addf %253, %257 : vector<8x32xf32>
    %259 = vector.extract_strided_slice %224 {offsets = [0, 7], sizes = [8, 1], strides = [1, 1]} : vector<8x8xf32> to vector<8x1xf32>
    %260 = vector.extract_strided_slice %2 {offsets = [0, 224], sizes = [8, 32], strides = [1, 1]} : vector<8x256xf32> to vector<8x32xf32>
    %261 = vector.broadcast %259 : vector<8x1xf32> to vector<8x32xf32>
    %262 = arith.mulf %261, %260 : vector<8x32xf32>
    %263 = arith.addf %258, %262 : vector<8x32xf32>
    %264 = tpu.concatenate %143, %183, %223, %263 in 1 : vector<8x32xf32>, vector<8x32xf32>, vector<8x32xf32>, vector<8x32xf32> -> vector<8x128xf32>
    %c0_14 = arith.constant 0 : index
    %c0_15 = arith.constant 0 : index
    %265 = vector.load %arg2[%c0_14, %c0_15] : memref<128x32xf32, #tpu.memory_space<vmem>>, vector<128x32xf32>
    %cst_16 = arith.constant dense<0.000000e+00> : vector<8x32xf32>
    %266 = tpu.matmul %264, %265, %cst_16 {dimension_numbers = #tpu.dot_dimension_numbers<[1], [0], [0], [1], [0, 0, 1, 1], [], []>} : vector<8x128xf32>, vector<128x32xf32>, vector<8x32xf32> -> vector<8x32xf32>
    %c0_17 = arith.constant 0 : index
    %c0_18 = arith.constant 0 : index
    %267 = vector.load %arg6[%c0_17, %c0_18] : memref<8x32xf32, #tpu.memory_space<vmem>>, vector<8x32xf32>
    tpu.vector_store %arg6[%c0_17, %c0_18], %266 {strides = array<i32>} : memref<8x32xf32, #tpu.memory_space<vmem>>, vector<8x32xf32>,
    return
  }
  func.func @transform_0(%arg0: i32) -> i32 {
    %c0_i32 = arith.constant 0 : i32
    %c0_i32_0 = arith.constant 0 : i32
    return %c0_i32 : i32
  }
  func.func @transform_1(%arg0: i32) -> (i32, i32) {
    %c0_i32 = arith.constant 0 : i32
    %c0_i32_0 = arith.constant 0 : i32
    %c0_i32_1 = arith.constant 0 : i32
    return %c0_i32, %c0_i32_0 : i32, i32
  }
  func.func @transform_2(%arg0: i32) -> (i32, i32) {
    %c0_i32 = arith.constant 0 : i32
    %c0_i32_0 = arith.constant 0 : i32
    return %arg0, %c0_i32 : i32, i32
  }
  func.func @transform_3(%arg0: i32) -> (i32, i32) {
    %c0_i32 = arith.constant 0 : i32
    %c0_i32_0 = arith.constant 0 : i32
    return %arg0, %c0_i32 : i32, i32
  }
  func.func @transform_4(%arg0: i32) -> (i32, i32) {
    %c0_i32 = arith.constant 0 : i32
    %c0_i32_0 = arith.constant 0 : i32
    return %arg0, %c0_i32 : i32, i32
  }
  func.func @transform_5(%arg0: i32) -> (i32, i32) {
    %c0_i32 = arith.constant 0 : i32
    %c0_i32_0 = arith.constant 0 : i32
    return %arg0, %c0_i32 : i32, i32
  }
}

</mosaic_0001>

<bundles_post_ra>
// kernel: tpu_custom_call.1
= control target key start
LH: loop header
LB: loop body
LE: loop exit
PB: predicated region body
PF: predicated region fallthrough
CT: control target
= control target key end

     0   :  { %10 = vsyncpa [#allocation4], 0  ;;  %s1355_s0 = inlined_call_operand.vmem [shape: f32[16], index: 0, kind: input, shape index: {}]   ;;  %s1356_s1 = inlined_call_operand.vmem [shape: f32[128,32], index: 1, kind: input, shape index: {}]   ;;  %s1357_s2 = inlined_call_operand.vmem [shape: f32[16,8], index: 2, kind: input, shape index: {}]   ;;  %s1358_s3 = inlined_call_operand.vmem [shape: f32[16,8], index: 3, kind: input, shape index: {}]   ;;  %s1359_s4 = inlined_call_operand.vmem [shape: f32[16,256], index: 4, kind: input, shape index: {}]   ;;  %s1360_s5 = inlined_call_operand.hbm [shape: f32[16,32], index: 5, kind: output, shape index: {}]  }
   0x1   :  { %11 = vsyncpa [#allocation3], 0 }
   0x2   :  { %13 = vsyncpa [#allocation3 + $0x1], 0  ;;  %s1095_s18 = smov 0   ;;  %s1097_s19 = smov 0  }
   0x3   :  { %s1099_s20 = smov 0   ;;  %s1101_s21 = smov 0  }
   0x4 LB: > { %s1116_s22 = sadd.s32 4294967295, %s1051_s21   ;;  %s843_s23 = sadd.s32 4294967294, %s1051_s21   ;;  %s1051_s21 = sphi %s1101_s21, %s1366_s21   ;;  %s1047_s20 = sphi %s1099_s20, %s1365_s20   ;;  %s1043_s19 = sphi %s1097_s19, %s1364_s19   ;;  %s1039_s18 = sphi %s1095_s18, %s1363_s18  }
   0x5   : > { %s1120_s24 = sadd.s32 1, %s1051_s21   ;;  %s146_s25 = sadd.s32 1, %s1047_s20 }
   0x6   : > { %s143_s26 = ssub.s32 %s1051_s21, %s1120_s24  ;;  %p156_p0 = scmp.ne.s32.totalorder %s1047_s20, %s1043_s19 }
   0x7   : > { %p144_p1 = scmp.eq.s32.totalorder %s143_s26, 0  ;;  %p157_p2 = scmp.eq.s32.totalorder %s1116_s22, 1 }
   0x8   : > { %p162_p3 = scmp.ne.s32.totalorder %s1043_s19, %s1039_s18  ;;  %p163_p4 = scmp.eq.s32.totalorder %s843_s23, 1 }
   0x9   : > { %s1131_s27 = scalar_select %p144_p1, %s1047_s20, %s146_s25  }
   0xa   : > { %p1133_p5 = por %p157_p2, %p156_p0  ;;  %p1137_p6 = por %p163_p4, %p162_p3 }
   0xb   : > { %p844_p7 = scmp.ge.s32.totalorder %s1051_s21, 1  ;;  %p170_p8 = scmp.lt.s32.totalorder %s1051_s21, 3 }
   0xc   : > { %p888_p9 = scmp.eq.s32.totalorder %s1116_s22, 0  ;;  %s182_s7 = sshll.u32 %s1355_s0, 4  ;;  %s183_s7 = int_to_ptr.vmem [resolvable:$true] %s182_s7 }
   0xd   : > { %p171_p10 = pnand %p844_p7, %p170_p8  ;;  %s1053_s8 = smov [#allocation2]  }
   0xf   : > { %p880_p11 = pneg %p171_p10  ;;  %220 = sbr.rel (%p171_p10) target bundleno = 631 (0x277), region = 40 }
  0x11   : > { %p881_p12 = pnand %p888_p9, %p880_p11 }
  0x13   : > { %883 = dma.vmem_to_smem (!%p881_p12), %s183_s7, 16, %s1053_s8, [#allocation4]  }
  0x14   : > { %1030 = dma.done.wait (%p888_p9), [#allocation4], 16  }
  0x15   : > { %1032 = vsyncadd (%p888_p9), [#allocation4], 4294967280 }
  0x16   : > { %227 = sfence }
  0x17   : > { %p258_p13 = scmp.lt.s32.totalorder %s1116_s22, 1  ;;  %s275_s9 = sld [smem:[#allocation2]]  ;;  %v1054_v0 = vmov 1   ;;  %vm689_vm8 = vcmask 261120   ;;  %vm691_vm9 = vcmask 523264   ;;  %vm693_vm10 = vcmask 785408  }
  0x18   : > { %937 = vset.pattern.permute.xlu1 %v1054_v0  ;;  %s854_s10 = sld [smem:[#allocation2 + $0x4]] }
  0x19   : > { %s1150_s11 = scalar_select %p258_p13, %s1116_s22, 1 }
  0x1a   : > { %s855_s12 = sld [smem:[#allocation2 + $0x8]] }
  0x1b   : > { %s850_s13 = sshll.u32 %s1150_s11, 3  ;;  %s1159_s26 = sld [smem:[#allocation2 + $0xc]] }
  0x1c   : > { %s261_s16 = scalar_lea.vmem %s1357_s2, %s850_s13  ;;  %s265_s25 = scalar_lea.vmem %s1358_s3, %s850_s13 }
  0x1d   : > { %v272_v1 = vld [vmem:[%s265_s25] sm:$0xff]  ;;  %v279_v3 = vstv %s275_s9  ;;  %s857_s30 = sld [smem:[#allocation2 + $0x1]]  ;;  %s873_s23 = sshll.u32 %s1150_s11, 4 }
  0x1e   : > { %v271_v2 = vld [vmem:[%s261_s16] sm:$0xff]  ;;  %v281_v4 = vstv %s854_s10  ;;  %s858_s6 = sld [smem:[#allocation2 + $0x5]]  ;;  %s1063_s11 = smov 96  }
  0x1f   : > { %v282_v5 = vsub.f32 %v272_v1, %v281_v4  ;;  %s859_s7 = sld [smem:[#allocation2 + $0x9]]  ;;  %v280_v6 = vsub.f32 %v271_v2, %v279_v3 }
  0x20   : > { %v287_v8 = vstv %s855_s12  ;;  %s861_s8 = sld [smem:[#allocation2 + $0x2]] }
  0x21   : > { %v283_v7 = vand.u32 2147483647, %v282_v5  ;;  %s862_s14 = sld [smem:[#allocation2 + $0x6]]  ;;  %v288_v12 = vmul.f32 %v287_v8, %v280_v6  ;;  %v290_v14 = vstv %s1159_s26  ;;  %v1056_v8 = vmov 0  }
  0x22   : > { %s1161_s15 = sld [smem:[#allocation2 + $0xa]]  ;;  %935 = vset.pattern.permute.xlu0 %v1056_v8 }
  0x23   : > { %v284_v9 = vsub.f32 6.2831855, %v283_v7  ;;  %v302_v10 = vstv %s857_s30  ;;  %s1163_s13 = sld [smem:[#allocation2 + $0xd]]  ;;  %v289_v21 = vmul.f32 %v288_v12, %v280_v6  ;;  %s1201_s30 = scalar_lea.vmem %s1359_s4, %s873_s23 }
  0x24   : > { %v304_v13 = vstv %s858_s6  ;;  %s1166_s9 = sld [smem:[#allocation2 + $0x3]]  ;;  %v303_v17 = vsub.f32 %v271_v2, %v302_v10  ;;  %s1062_s6 = smov 64  }
  0x25   : > { %v285_v11 = vand.u32 2147483647, %v284_v9  ;;  %v305_v15 = vsub.f32 %v272_v1, %v304_v13  ;;  %s866_s10 = sld [smem:[#allocation2 + $0x7]]  ;;  %v310_v19 = vstv %s859_s7  ;;  %s1064_s7 = smov 32  }
  0x26   : > { %s1168_s12 = sld [smem:[#allocation2 + $0xe]]  ;;  %v325_v20 = vstv %s861_s8  ;;  %v311_v27 = vmul.f32 %v310_v19, %v303_v17  ;;  %s255_s8 = sand.u32 1, %s1043_s19  }
  0x27   : > { %v286_v16 = vmin.f32 %v283_v7, %v285_v11  ;;  %v306_v18 = vand.u32 2147483647, %v305_v15  ;;  %v327_v23 = vstv %s862_s14  ;;  %s1170_s16 = sld [smem:[#allocation2 + $0xb]]  ;;  %v326_v28 = vsub.f32 %v271_v2, %v325_v20  ;;  %s849_s14 = sshll.u32 %s255_s8, 3 }
  0x28   : > { %v328_v25 = vsub.f32 %v272_v1, %v327_v23  ;;  %v333_v31 = vstv %s1161_s15  ;;  %s1174_s17 = sld [smem:[#allocation2 + $0xf]]  ;;  %v312_v40 = vmul.f32 %v311_v27, %v303_v17  ;;  %v1055_v7 = vmov 2   ;;  %s870_s15 = sshll.u32 %s1116_s22, 3 }
  0x29   : > { %v291_v22 = vmul.f32 %v290_v14, %v286_v16  ;;  %v307_v24 = vsub.f32 6.2831855, %v306_v18  ;;  %v313_v33 = vstv %s1163_s13  ;;  %v334_v41 = vmul.f32 %v333_v31, %v326_v28  ;;  %938 = vset.pattern.permute.xlu2 %v1055_v7  ;;  %s733_s23 = scalar_lea.sflag [#allocation3], %s255_s8 }
  0x2a   : > { %v329_v30 = vand.u32 2147483647, %v328_v25  ;;  %v348_v34 = vstv %s1166_s9  ;;  %v1057_v31 = vmov 3  }
  0x2b   : > { %v292_v26 = vmul.f32 %v291_v22, %v286_v16  ;;  %v308_v29 = vand.u32 2147483647, %v307_v24  ;;  %v350_v35 = vstv %s866_s10  ;;  %v349_v44 = vsub.f32 %v271_v2, %v348_v34  ;;  %s743_s10 = scalar_lea.hbm %s1360_s5, %s870_s15 }
  0x2c   : > { %v330_v37 = vsub.f32 6.2831855, %v329_v30  ;;  %v351_v38 = vsub.f32 %v272_v1, %v350_v35  ;;  %v336_v46 = vstv %s1168_s12  ;;  %v335_v51 = vmul.f32 %v334_v41, %v326_v28  ;;  %s257_s12 = scalar_lea.vmem [#allocation5], %s849_s14 }
  0x2d   : > { %v293_v32 = vadd.f32 %v292_v26, %v289_v21  ;;  %v309_v36 = vmin.f32 %v306_v18, %v308_v29  ;;  %v356_v47 = vstv %s1170_s16  ;;  %v1061_v34 = vmov 4   ;;  %s745_s16 = sshll.u32 %s257_s12, 4  ;;  %s746_s16 = int_to_ptr.vmem [resolvable:$true] %s745_s16 }
  0x2e   : > { %v331_v43 = vand.u32 2147483647, %v330_v37  ;;  %v352_v45 = vand.u32 2147483647, %v351_v38  ;;  %v357_v55 = vmul.f32 %v356_v47, %v349_v44  ;;  %v359_v56 = vstv %s1174_s17  ;;  %s747_s17 = sshll.u32 %s743_s10, 4  ;;  %s748_s17 = int_to_ptr.hbm [resolvable:$true] %s747_s17 }
  0x2f   : > { %v294_v39 = vmul.f32 1.442695, %v293_v32  ;;  %v314_v42 = vmul.f32 %v313_v33, %v309_v36  ;;  %v1058_v32 = vmov 6   ;;  %v1059_v33 = vmov 5   ;;  %s999_s25 = sshra.s32 %s748_s17, 4  ;;  %s1000_s25 = int_to_ptr.hbm [resolvable:$true] %s999_s25 }
  0x30   : > { %v332_v49 = vmin.f32 %v329_v30, %v331_v43  ;;  %v353_v50 = vsub.f32 6.2831855, %v352_v45  ;;  %v358_v62 = vmul.f32 %v357_v55, %v349_v44  ;;  %s1001_s26 = scalar_lea.hbm %s1000_s25, 8  ;;  %p1006_p3 = scmp.lt.s32.totalorder %s1000_s25, %s1360_s5 }
  0x31   : > { %960 = vpow2.f32 %v294_v39  ;;  %v315_v48 = vmul.f32 %v314_v42, %v309_v36  ;;  %v1204_v36 = vld [vmem:[%s1201_s30] sm:$0xff]  ;;  %p1002_p0 = scmp.ne.s32.totalorder %s1000_s25, %s1001_s26 }
  0x32   : > { %v337_v53 = vmul.f32 %v336_v46, %v332_v49  ;;  %v354_v54 = vand.u32 2147483647, %v353_v50 }
  0x33   : > { %v316_v52 = vadd.f32 %v315_v48, %v312_v40  ;;  %p1003_p1 = pnand %p1002_p0, %p1133_p5 }
  0x34   : > { %v338_v58 = vmul.f32 %v337_v53, %v332_v49  ;;  %v355_v59 = vmin.f32 %v352_v45, %v354_v54 }
  0x35   : > { %v317_v57 = vmul.f32 1.442695, %v316_v52  ;;  %p1004_p2 = pneg %p1003_p1 }
  0x36   : > { %v339_v61 = vadd.f32 %v338_v58, %v335_v51  ;;  %v360_v63 = vmul.f32 %v359_v56, %v355_v59  ;;  %v1226_v58 = vld [vmem:[%s1201_s30 + $0x8] sm:$0xff] }
  0x37   : > { %v961_v60 = vpop.eup %960  ;;  %962 = vpow2.f32 %v317_v57 }
  0x38   : > { %v340_v1 = vmul.f32 1.442695, %v339_v61  ;;  %v361_v2 = vmul.f32 %v360_v63, %v355_v59  ;;  %vm296_vm0 = vcmp.ne.f32.partialorder %v961_v60, %v961_v60 }
  0x39   : > { %v297_v5 = vsel %vm296_vm0, 0.0, %v961_v60 }
  0x3a   : > { %964 = vpow2.f32 %v340_v1  ;;  %v362_v3 = vadd.f32 %v361_v2, %v358_v62 }
  0x3c   : > { %v363_v6 = vmul.f32 1.442695, %v362_v3 }
  0x3d   : > { %v963_v4 = vpop.eup %962 }
  0x3e   : > { %vm319_vm1 = vcmp.ne.f32.partialorder %v963_v4, %v963_v4  ;;  %966 = vpow2.f32 %v363_v6 }
  0x3f   : > { %v320_v9 = vsel %vm319_vm1, 0.0, %v963_v4 }
  0x40   : > { %v367_v10 = vadd.f32 %v320_v9, %v297_v5  ;;  %v965_v11 = vpop.eup %964 }
  0x41   : > { %vm342_vm2 = vcmp.ne.f32.partialorder %v965_v11, %v965_v11 }
  0x42   : > { %v343_v12 = vsel %vm342_vm2, 0.0, %v965_v11 }
  0x43   : > { %v368_v13 = vadd.f32 %v367_v10, %v343_v12 }
  0x44   : > { %v967_v14 = vpop.eup %966 }
  0x45   : > { %vm365_vm3 = vcmp.ne.f32.partialorder %v967_v14, %v967_v14 }
  0x46   : > { %v366_v15 = vsel %vm365_vm3, 0.0, %v967_v14 }
  0x47   : > { %v369_v16 = vadd.f32 %v368_v13, %v366_v15 }
  0x49   : > { %968 = vrcp.f32 %v369_v16  ;;  %v381_v19 = vand.u32 2147483648, %v369_v16  ;;  %vm375_vm4 = vweird.f32 %v369_v16  ;;  %v379_v21 = vand.u32 2147483647, %v369_v16 }
  0x4b   : > { %v382_v23 = vor.u32 1.1754944e-38, %v381_v19  ;;  %vm380_vm7 = vcmp.eq.f32.partialorder %v379_v21, 8.507059e+37 }
  0x4f   : > { %v969_v17 = vpop.eup %968 }
  0x50   : > { %v371_v18 = vmul.f32 %v969_v17, %v369_v16  ;;  %vm376_vm5 = vweird.f32 %v969_v17 }
  0x51   : > { %vm377_vm6 = vmor %vm375_vm4, %vm376_vm5 }
  0x52   : > { %v372_v20 = vsub.f32 1.0, %v371_v18 }
  0x54   : > { %v373_v22 = vmul.f32 %v969_v17, %v372_v20 }
  0x56   : > { %v374_v24 = vadd.f32 %v969_v17, %v373_v22 }
  0x58   : > { %v378_v25 = vsel %vm377_vm6, %v969_v17, %v374_v24 }
  0x59   : > { %v383_v26 = vsel %vm380_vm7, %v382_v23, %v378_v25 }
  0x5a   : > { %v458_v27 = vmul.f32 %v383_v26, %v320_v9  ;;  %v1182_v28 = vmul.f32 %v383_v26, %v297_v5  ;;  %v531_v29 = vmul.f32 %v383_v26, %v343_v12  ;;  %v604_v30 = vmul.f32 %v383_v26, %v366_v15 }
  0x5c   : > { %466 = vperm.xlu1 %937, %v458_v27   ;;  %476 = vperm.xlu2 %938, %v458_v27  }
  0x5d   : > { %388 = vperm.xlu0 %935, %v1182_v28  }
  0x64   : > { %539 = vperm.xlu1 %937, %v531_v29   ;;  %939 = vset.pattern.permute.xlu2 %v1054_v0 }
  0x65   : > { %612 = vperm.xlu2 %939, %v604_v30   ;;  %936 = vset.pattern.permute.xlu0 %v1054_v0  ;;  %v1060_v0 = vmov 7  }
  0x66   : > { %393 = vperm.xlu0 %936, %v1182_v28  }
  0x6c   : > { %940 = vset.pattern.permute.xlu1 %v1055_v7 }
  0x6d   : > { %549 = vperm.xlu1 %940, %v531_v29   ;;  %941 = vset.pattern.permute.xlu2 %v1057_v31 }
  0x6e   : > { %486 = vperm.xlu2 %941, %v458_v27   ;;  %942 = vset.pattern.permute.xlu0 %v1055_v7 }
  0x6f   : > { %622 = vperm.xlu0 %942, %v604_v30  }
  0x75   : > { %943 = vset.pattern.permute.xlu1 %v1057_v31 }
  0x76   : > { %559 = vperm.xlu1 %943, %v531_v29   ;;  %632 = vperm.xlu2 %941, %v604_v30  }
  0x77   : > { %946 = vset.pattern.permute.xlu0 %v1058_v32 }
  0x78   : > { %512 = vperm.xlu0 %946, %v458_v27  }
  0x7e   : > { %944 = vset.pattern.permute.xlu1 %v1059_v33  ;;  %945 = vset.pattern.permute.xlu2 %v1059_v33 }
  0x7f   : > { %502 = vperm.xlu1 %944, %v458_v27   ;;  %575 = vperm.xlu2 %945, %v531_v29  }
  0x80   : > { %949 = vset.pattern.permute.xlu0 %v1060_v0 }
  0x81   : > { %595 = vperm.xlu0 %949, %v531_v29  }
  0x87   : > { %648 = vperm.xlu1 %944, %v604_v30   ;;  %947 = vset.pattern.permute.xlu2 %v1058_v32 }
  0x88   : > { %585 = vperm.xlu2 %947, %v531_v29  }
  0x89   : > { %953 = vset.pattern.permute.xlu0 %v1057_v31 }
  0x8a   : > { %413 = vperm.xlu0 %953, %v1182_v28  }
  0x8f   : > { %948 = vset.pattern.permute.xlu1 %v1060_v0 }
  0x90   : > { %522 = vperm.xlu1 %948, %v458_v27   ;;  %658 = vperm.xlu2 %947, %v604_v30  }
  0x92   : > { %954 = vset.pattern.permute.xlu0 %v1061_v34 }
  0x93   : > { %496 = vperm.xlu0 %954, %v458_v27  }
  0x98   : > { %668 = vperm.xlu1 %948, %v604_v30   ;;  %950 = vset.pattern.permute.xlu2 %v1056_v8 }
  0x99   : > { %461 = vperm.xlu2 %950, %v458_v27  }
  0x9b   : > { %959 = vset.pattern.permute.xlu0 %v1060_v0 }
  0xa0   : > { %951 = vset.pattern.permute.xlu1 %v1056_v8 }
  0xa1   : > { %952 = vset.pattern.permute.xlu2 %v1055_v7  ;;  %534 = vperm.xlu1 %951, %v531_v29  }
  0xa2   : > { %403 = vperm.xlu2 %952, %v1182_v28  }
  0xa9   : > { %607 = vperm.xlu1 %951, %v604_v30  }
  0xaa   : > { %956 = vset.pattern.permute.xlu2 %v1059_v33 }
  0xab   : > { %429 = vperm.xlu2 %956, %v1182_v28  }
  0xb1   : > { %955 = vset.pattern.permute.xlu1 %v1061_v34 }
  0xb2   : > { %569 = vperm.xlu1 %955, %v531_v29  }
  0xb3   : > { %957 = vset.pattern.permute.xlu2 %v1058_v32 }
  0xb4   : > { %439 = vperm.xlu2 %957, %v1182_v28  }
  0xb6   : > { %v477_v35 = vpop.permute.xlu2 %476 }
  0xb7   : > { %v479_v37 = vmul.f32 %v477_v35, %v1204_v36 }
  0xba   : > { %642 = vperm.xlu1 %955, %v604_v30  }
  0xbc   : > { %958 = vset.pattern.permute.xlu2 %v1060_v0 }
  0xbd   : > { %449 = vperm.xlu2 %958, %v1182_v28  }
  0xbf   : > { %v613_v38 = vpop.permute.xlu2 %612 }
  0xc0   : > { %v615_v49 = vmul.f32 %v613_v38, %v1204_v36 }
  0xc2   : > { %481 = vrot.lane.b32.xlu1 %v479_v37, %s1062_s6 }
  0xc8   : > { %v487_v39 = vpop.permute.xlu2 %486 }
  0xc9   : > { %v489_v55 = vmul.f32 %v487_v39, %v1204_v36 }
  0xce   : > { %v467_v40 = vpop.permute.xlu1 %466 }
  0xcf   : > { %v469_v41 = vmul.f32 %v467_v40, %v1204_v36  ;;  %v1210_v42 = vpop.permute.xlu0 %388 }
  0xd0   : > { %v633_v43 = vpop.permute.xlu2 %632 }
  0xd1   : > { %471 = vrot.lane.b32.xlu0 %v469_v41, %s1063_s11  ;;  %v635_v44 = vmul.f32 %v633_v43, %v1204_v36 }
  0xd6   : > { %v540_v45 = vpop.permute.xlu1 %539 }
  0xd7   : > { %v542_v46 = vmul.f32 %v540_v45, %v1204_v36 }
  0xd8   : > { %v394_v47 = vpop.permute.xlu0 %393 }
  0xd9   : > { %544 = vrot.lane.b32.xlu2 %v542_v46, %s1063_s11  ;;  %v576_v48 = vpop.permute.xlu2 %575  ;;  %637 = vrot.lane.b32.xlu0 %v635_v44, %s1064_s7  ;;  %v396_v20 = vmul.f32 %v394_v47, %v1204_v36 }
  0xda   : > { %v578_v59 = vmul.f32 %v576_v48, %v1226_v58 }
  0xdf   : > { %v550_v50 = vpop.permute.xlu1 %549 }
  0xe0   : > { %v552_v51 = vmul.f32 %v550_v50, %v1204_v36 }
  0xe1   : > { %617 = vrot.lane.b32.xlu2 %v615_v49, %s1063_s11  ;;  %v623_v53 = vpop.permute.xlu0 %622 }
  0xe2   : > { %554 = vrot.lane.b32.xlu1 %v552_v51, %s1062_s6  ;;  %v586_v52 = vpop.permute.xlu2 %585  ;;  %v625_v54 = vmul.f32 %v623_v53, %v1204_v36 }
  0xe3   : > { %v588_v2 = vmul.f32 %v586_v52, %v1226_v58 }
  0xe8   : > { %v560_v56 = vpop.permute.xlu1 %559 }
  0xe9   : > { %491 = vrot.lane.b32.xlu2 %v489_v55, %s1064_s7  ;;  %v562_v60 = vmul.f32 %v560_v56, %v1204_v36 }
  0xea   : > { %627 = vrot.lane.b32.xlu1 %v625_v54, %s1062_s6  ;;  %v659_v57 = vpop.permute.xlu2 %658  ;;  %v513_v63 = vpop.permute.xlu0 %512 }
  0xeb   : > { %v515_v3 = vmul.f32 %v513_v63, %v1226_v58  ;;  %v661_v9 = vmul.f32 %v659_v57, %v1226_v58 }
  0xf1   : > { %v503_v61 = vpop.permute.xlu1 %502  ;;  %564 = vrot.lane.b32.xlu2 %v562_v60, %s1064_s7 }
  0xf2   : > { %v505_v62 = vmul.f32 %v503_v61, %v1226_v58  ;;  %580 = vrot.lane.b32.xlu1 %v578_v59, %s1063_s11 }
  0xf3   : > { %v462_v1 = vpop.permute.xlu2 %461  ;;  %v596_v6 = vpop.permute.xlu0 %595 }
  0xf4   : > { %507 = vrot.lane.b32.xlu0 %v505_v62, %s1063_s11  ;;  %v598_v8 = vmul.f32 %v596_v6, %v1226_v58  ;;  %v464_v46 = vmul.f32 %v462_v1, %v1204_v36 }
  0xf9   : > { %v649_v4 = vpop.permute.xlu1 %648  ;;  %590 = vrot.lane.b32.xlu2 %v588_v2, %s1062_s6 }
  0xfa   : > { %v651_v5 = vmul.f32 %v649_v4, %v1226_v58 }
  0xfc   : > { %653 = vrot.lane.b32.xlu1 %v651_v5, %s1063_s11  ;;  %517 = vrot.lane.b32.xlu0 %v515_v3, %s1062_s6  ;;  %v404_v7 = vpop.permute.xlu2 %403  ;;  %v414_v17 = vpop.permute.xlu0 %413 }
  0xfd   : > { %v406_v12 = vmul.f32 %v404_v7, %v1204_v36  ;;  %v416_v19 = vmul.f32 %v414_v17, %v1204_v36  ;;  %v706_v17 = vld [vmem:[%s1356_s1 + $0x58] sm:$0xff] }
 0x101   : > { %600 = vrot.lane.b32.xlu2 %v598_v8, %s1064_s7 }
 0x102   : > { %v523_v10 = vpop.permute.xlu1 %522 }
 0x103   : > { %v525_v11 = vmul.f32 %v523_v10, %v1226_v58 }
 0x104   : > { %663 = vrot.lane.b32.xlu1 %v661_v9, %s1062_s6 }
 0x105   : > { %527 = vrot.lane.b32.xlu0 %v525_v11, %s1064_s7  ;;  %v430_v13 = vpop.permute.xlu2 %429  ;;  %v497_v30 = vpop.permute.xlu0 %496 }
 0x106   : > { %v432_v16 = vmul.f32 %v430_v13, %v1226_v58  ;;  %v499_v56 = vmul.f32 %v497_v30, %v1226_v58  ;;  %v710_v13 = vld [vmem:[%s1356_s1 + $0x78] sm:$0xff] }
 0x107   : > { %711 = vmatpush.msra.mxu0 %v710_v13 }
 0x109   : > { %408 = vrot.lane.b32.xlu2 %v406_v12, %s1062_s6 }
 0x10a   : > { %v669_v14 = vpop.permute.xlu1 %668 }
 0x10b   : > { %v671_v15 = vmul.f32 %v669_v14, %v1226_v58  ;;  %v709_v14 = vld [vmem:[%s1356_s1 + $0x70] sm:$0xff] }
 0x10c   : > { %423 = vperm.xlu1 %955, %v1182_v28   ;;  %712 = vmatpush.msra.mxu0 %v709_v14 }
 0x10d   : > { %673 = vrot.lane.b32.xlu0 %v671_v15, %s1064_s7  ;;  %v708_v15 = vld [vmem:[%s1356_s1 + $0x68] sm:$0xff] }
 0x10e   : > { %v440_v18 = vpop.permute.xlu2 %439  ;;  %713 = vmatpush.msra.mxu0 %v708_v15 }
 0x10f   : > { %v442_v23 = vmul.f32 %v440_v18, %v1226_v58  ;;  %v705_v18 = vld [vmem:[%s1356_s1 + $0x50] sm:$0xff] }
 0x111   : > { %434 = vrot.lane.b32.xlu2 %v432_v16, %s1063_s11  ;;  %v707_v16 = vld [vmem:[%s1356_s1 + $0x60] sm:$0xff] }
 0x112   : > { %714 = vmatpush.msra.mxu0 %v707_v16 }
 0x113   : > { %v535_v24 = vpop.permute.xlu1 %534 }
 0x114   : > { %398 = vrot.lane.b32.xlu1 %v396_v20, %s1063_s11  ;;  %v537_v0 = vmul.f32 %v535_v24, %v1204_v36  ;;  %715 = vmatpush.msra.mxu0 %v706_v17  ;;  %v703_v20 = vld [vmem:[%s1356_s1 + $0x40] sm:$0xff] }
 0x115   : > { %418 = vrot.lane.b32.xlu0 %v416_v19, %s1064_s7  ;;  %v704_v19 = vld [vmem:[%s1356_s1 + $0x48] sm:$0xff]  ;;  %v699_v24 = vld [vmem:[%s1356_s1 + $0x20] sm:$0xff] }
 0x116   : > { %716 = vmatpush.msra.mxu0 %v705_v18 }
 0x117   : > { %v450_v21 = vpop.permute.xlu2 %449 }
 0x118   : > { %v452_v22 = vmul.f32 %v450_v21, %v1226_v58  ;;  %717 = vmatpush.msra.mxu0 %v704_v19  ;;  %v702_v21 = vld [vmem:[%s1356_s1 + $0x38] sm:$0xff] }
 0x11a   : > { %718 = vmatpush.msra.mxu0 %v703_v20 }
 0x11b   : > { %v608_v25 = vpop.permute.xlu1 %607 }
 0x11c   : > { %454 = vrot.lane.b32.xlu1 %v452_v22, %s1064_s7  ;;  %v610_v55 = vmul.f32 %v608_v25, %v1204_v36  ;;  %v701_v22 = vld [vmem:[%s1356_s1 + $0x30] sm:$0xff]  ;;  %719 = vmatpush.msra.mxu0 %v702_v21 }
 0x11d   : > { %444 = vrot.lane.b32.xlu0 %v442_v23, %s1062_s6  ;;  %v700_v23 = vld [vmem:[%s1356_s1 + $0x28] sm:$0xff] }
 0x11e   : > { %720 = vmatpush.msra.mxu0 %v701_v22 }
 0x120   : > { %721 = vmatpush.msra.mxu0 %v700_v23 }
 0x122   : > { %722 = vmatpush.msra.mxu0 %v699_v24 }
 0x124   : > { %v570_v27 = vpop.permute.xlu1 %569 }
 0x125   : > { %v572_v44 = vmul.f32 %v570_v27, %v1226_v58  ;;  %v697_v27 = vld [vmem:[%s1356_s1 + $0x10] sm:$0xff] }
 0x12c   : > { %v643_v29 = vpop.permute.xlu1 %642 }
 0x12d   : > { %v645_v5 = vmul.f32 %v643_v29, %v1226_v58  ;;  %v695_v29 = vld [vmem:[%s1356_s1] sm:$0xff] }
 0x133   : > { %v545_v26 = vpop.permute.xlu2 %544 }
 0x134   : > { %v482_v32 = vpop.permute.xlu1 %481  ;;  %v547_v37 = vadd.f32 %v545_v26, %v537_v0  ;;  %v698_v26 = vld [vmem:[%s1356_s1 + $0x18] sm:$0xff] }
 0x135   : > { %723 = vmatpush.msra.mxu0 %v698_v26 }
 0x137   : > { %724 = vmatpush.msra.mxu0 %v697_v27 }
 0x13b   : > { %v618_v28 = vpop.permute.xlu2 %617 }
 0x13c   : > { %v620_v60 = vadd.f32 %v618_v28, %v610_v55  ;;  %v696_v28 = vld [vmem:[%s1356_s1 + $0x8] sm:$0xff] }
 0x13d   : > { %725 = vmatpush.msra.mxu0 %v696_v28 }
 0x13f   : > { %726 = vmatpush.msra.mxu0 %v695_v29 }
 0x143   : > { %v492_v31 = vpop.permute.xlu2 %491  ;;  %v472_v34 = vpop.permute.xlu0 %471 }
 0x144   : > { %v474_v49 = vadd.f32 %v472_v34, %v464_v46 }
 0x146   : > { %v484_v54 = vadd.f32 %v482_v32, %v474_v49 }
 0x148   : > { %v494_v57 = vadd.f32 %v492_v31, %v484_v54  ;;  %v391_v31 = vmul.f32 %v1210_v42, %v1204_v36 }
 0x14a   : > { %v500_v63 = vadd.f32 %v499_v56, %v494_v57 }
 0x14b   : > { %v565_v35 = vpop.permute.xlu2 %564  ;;  %v638_v40 = vpop.permute.xlu0 %637 }
 0x153   : > { %v591_v41 = vpop.permute.xlu2 %590 }
 0x154   : > { %v555_v33 = vpop.permute.xlu1 %554 }
 0x155   : > { %v557_v38 = vadd.f32 %v555_v33, %v547_v37 }
 0x157   : > { %v567_v43 = vadd.f32 %v565_v35, %v557_v38 }
 0x159   : > { %v573_v45 = vadd.f32 %v572_v44, %v567_v43 }
 0x15b   : > { %v601_v51 = vpop.permute.xlu2 %600 }
 0x15c   : > { %v628_v39 = vpop.permute.xlu1 %627 }
 0x15d   : > { %v630_v62 = vadd.f32 %v628_v39, %v620_v60 }
 0x15f   : > { %v640_v2 = vadd.f32 %v638_v40, %v630_v62 }
 0x161   : > { %v646_v7 = vadd.f32 %v645_v5, %v640_v2 }
 0x163   : > { %v409_v33 = vpop.permute.xlu2 %408 }
 0x164   : > { %v581_v47 = vpop.permute.xlu1 %580 }
 0x165   : > { %v583_v48 = vadd.f32 %v581_v47, %v573_v45 }
 0x166   : > { %v508_v50 = vpop.permute.xlu0 %507 }
 0x167   : > { %v593_v52 = vadd.f32 %v591_v41, %v583_v48  ;;  %v510_v1 = vadd.f32 %v508_v50, %v500_v63 }
 0x169   : > { %v603_v53 = vadd.f32 %v601_v51, %v593_v52 }
 0x16b   : > { %682 = vrot.lane.b32.xlu0 %v603_v53, %s1062_s6  ;;  %v435_v39 = vpop.permute.xlu2 %434  ;;  %s1005_s6 = scalar_lea.hbm %s1360_s5, 16 }
 0x16c   : > { %p1007_p4 = scmp.lt.s32.totalorder %s1005_s6, %s1001_s26 }
 0x16e   : > { %v518_v59 = vpop.permute.xlu0 %517  ;;  %v654_v61 = vpop.permute.xlu1 %653  ;;  %p1008_p7 = por %p1007_p4, %p1006_p3 }
 0x16f   : > { %v520_v3 = vadd.f32 %v518_v59, %v510_v1  ;;  %v656_v9 = vadd.f32 %v654_v61, %v646_v7 }
 0x170   : > { %p1009_p8 = pnand %p1008_p7, %p1004_p2 }
 0x176   : > { %v664_v8 = vpop.permute.xlu1 %663 }
 0x177   : > { %v528_v4 = vpop.permute.xlu0 %527  ;;  %v666_v10 = vadd.f32 %v664_v8, %v656_v9 }
 0x178   : > { %v530_v6 = vadd.f32 %v528_v4, %v520_v3 }
 0x17a   : > { %678 = vrot.lane.b32.xlu2 %v530_v6, %s1064_s7 }
 0x17e   : > { %v424_v25 = vpop.permute.xlu1 %423 }
 0x17f   : > { %v674_v11 = vpop.permute.xlu0 %673  ;;  %v426_v37 = vmul.f32 %v424_v25, %v1226_v58 }
 0x180   : > { %v676_v12 = vadd.f32 %v674_v11, %v666_v10 }
 0x182   : > { %686 = vrot.lane.b32.xlu1 %v676_v12, %s1063_s11 }
 0x186   : > { %v399_v30 = vpop.permute.xlu1 %398 }
 0x187   : > { %v401_v32 = vadd.f32 %v399_v30, %v391_v31  ;;  %v419_v34 = vpop.permute.xlu0 %418 }
 0x189   : > { %v411_v0 = vadd.f32 %v409_v33, %v401_v32 }
 0x18b   : > { %v421_v35 = vadd.f32 %v419_v34, %v411_v0 }
 0x18d   : > { %v427_v38 = vadd.f32 %v426_v37, %v421_v35 }
 0x18e   : > { %v455_v43 = vpop.permute.xlu1 %454 }
 0x18f   : > { %v437_v40 = vadd.f32 %v435_v39, %v427_v38  ;;  %v445_v41 = vpop.permute.xlu0 %444 }
 0x191   : > { %v447_v44 = vadd.f32 %v445_v41, %v437_v40 }
 0x193   : > { %v457_v46 = vadd.f32 %v455_v43, %v447_v44 }
 0x1d4   : > { %v679_v45 = vpop.permute.xlu2 %678 }
 0x1d5   : > { %v690_v42 = vsel %vm689_vm8, %v457_v46, %v679_v45 }
 0x1dd   : > { %v683_v36 = vpop.permute.xlu0 %682 }
 0x1de   : > { %v692_v47 = vsel %vm691_vm9, %v690_v42, %v683_v36 }
 0x1f4   : > { %v687_v48 = vpop.permute.xlu1 %686 }
 0x1f5   : > { %v694_v49 = vsel %vm693_vm10, %v692_v47, %v687_v48 }
 0x1f6   : > { %727 = vmatmul.f32.vlgmr.msra.gmra.mxu0 %v694_v49 }
 0x273   : > { %v728_v58 = vpop.f32.mrf.mxu0 }
 0x274   : > { %731 = vst.msk [vmem:[%s257_s12] sm:$0xff] %vm689_vm8, %v728_v58 }
 0x275   : > { %1012 = shalt.err (!%p1009_p8)
}
 0x276   : > { %878 = dma.vmem_to_hbm [thread:$0]  (%p1133_p5), %s746_s16, 128, %s748_s17, %s733_s23  }
 0x277 PF: > { %p890_p9 = scmp.ge.s32.totalorder %s1051_s21, 2  ;;  %s759_s8 = sand.u32 1, %s1039_s18  }
 0x278   : > { %s760_s14 = scalar_lea.sflag [#allocation3], %s759_s8 }
 0x279   : > { %p885_p10 = pnand %p890_p9, %p1137_p6 }
 0x27b   : > { %p886_p11 = pneg %p885_p10 }
 0x27d   : > { %1034 = dma.done.wait (%p886_p11), %s760_s14, 128  }
 0x27e   : > { %1036 = vsyncadd (%p886_p11), %s760_s14, 4294967168  ;;  %p16_p12 = scmp.ge.s32.totalorder %s1120_s24, 4   ;;  %s1363_s18 = smov %s1043_s19 }
 0x27f   : > { %s1364_s19 = smov %s1047_s20  ;;  %s1365_s20 = smov %s1131_s27 }
 0x280   : > { %s1366_s21 = smov %s1120_s24  ;;  %18 = sbr.rel (!%p16_p12) target bundleno = 4 (0x4), region = 86 }
 0x285   :  { %766 = vsyncpa [#allocation3], 1 }
 0x286   :  { %768 = vsyncpa [#allocation3 + $0x1], 1 }
 0x287   :  { %769 = vsyncpa [#allocation4], 1 }
 0x288   :  { %771 = vsyncpa [#allocation4 + $0x1], 1 }

</bundles_post_ra>
